<compile_context>
chip_gen: v7x
topology: tpu7x:2x2x1
jax: 0.10.0
libtpu: 0.0.40
codegen_flags: <defaults>
</compile_context>

<pallas_src>
import math
import functools

import numpy as np
import jax
import jax.numpy as jnp
from jax.experimental import pallas as pl
from jax.experimental.pallas import tpu as pltpu


# ----------------------------------------------------------------------------
# In-kernel math helpers (traced into Pallas kernel bodies)
# ----------------------------------------------------------------------------
def _ln(x, g, b, eps=1e-5):
    mean = jnp.mean(x, axis=-1, keepdims=True)
    var = jnp.mean(jnp.square(x - mean), axis=-1, keepdims=True)  # biased (PyTorch LN)
    return (x - mean) * jax.lax.rsqrt(var + eps) * g + b


def _erf(x):
    # Abramowitz & Stegun 7.1.26 (|err| ~ 1.5e-7); reciprocal routed to the EUP
    # (approx) since the polynomial is the accuracy floor anyway.
    a1, a2, a3, a4, a5 = 0.254829592, -0.284496736, 1.421413741, -1.453152027, 1.061405429
    p = 0.3275911
    ax = jnp.abs(x)
    t = pl.reciprocal(1.0 + p * ax, approx=True)
    poly = ((((a5 * t + a4) * t + a3) * t + a2) * t + a1) * t
    y = 1.0 - poly * jnp.exp(-ax * ax)
    return jnp.where(x >= 0.0, y, -y)


def _gelu(x):
    return 0.5 * x * (1.0 + _erf(x * 0.7071067811865476))


def _block_step(x, ln1, wqkv, bqkv, wproj, bproj, ln2, w1, b1, w2, b2,
                num_heads, scale):
    """One pre-norm ViT block on a VMEM-resident (T, D) activation."""
    D = x.shape[-1]
    Dh = D // num_heads

    # --- Multi-head self attention: single fused QKV matmul ------------------
    h = _ln(x, ln1[0:1, :], ln1[1:2, :])
    qkv = jnp.dot(h, wqkv, preferred_element_type=jnp.float32) + bqkv      # (T, 3D)
    heads = []
    for hh in range(num_heads):                                            # unrolled
        q = qkv[:, hh * Dh:(hh + 1) * Dh] * scale
        k = qkv[:, D + hh * Dh:D + (hh + 1) * Dh]
        v = qkv[:, 2 * D + hh * Dh:2 * D + (hh + 1) * Dh]
        s = jax.lax.dot_general(q, k, (((1,), (1,)), ((), ())),
                                preferred_element_type=jnp.float32)        # (T, T)
        s = s - jnp.max(s, axis=-1, keepdims=True)
        e = jnp.exp(s)
        p_attn = e * pl.reciprocal(jnp.sum(e, axis=-1, keepdims=True), approx=True)
        heads.append(jnp.dot(p_attn, v, preferred_element_type=jnp.float32))
    attn = jnp.concatenate(heads, axis=-1)                                  # (T, D)
    x = x + jnp.dot(attn, wproj, preferred_element_type=jnp.float32) + bproj

    # --- MLP ------------------------------------------------------------------
    h2 = _ln(x, ln2[0:1, :], ln2[1:2, :])
    h2 = jnp.dot(h2, w1, preferred_element_type=jnp.float32) + b1
    h2 = _gelu(h2)
    h2 = jnp.dot(h2, w2, preferred_element_type=jnp.float32) + b2
    return x + h2


# ----------------------------------------------------------------------------
# Pallas kernels
# ----------------------------------------------------------------------------
def _patch_embed_kernel(p_ref, w_ref, b_ref, pos_ref, o_ref):
    o_ref[0] = (jnp.dot(p_ref[0], w_ref[...], preferred_element_type=jnp.float32)
                + b_ref[...] + pos_ref[...])


def pallas_patch_embed(patches, w, b, pos):
    """Patch projection + bias + (non-cls) positional embedding, fused."""
    B, N, Pd = patches.shape
    E = w.shape[1]
    return pl.pallas_call(
        _patch_embed_kernel,
        out_shape=jax.ShapeDtypeStruct((B, N, E), jnp.float32),
        grid=(B,),
        in_specs=[
            pl.BlockSpec((1, N, Pd), lambda i: (i, 0, 0)),
            pl.BlockSpec((Pd, E), lambda i: (0, 0)),
            pl.BlockSpec((1, E), lambda i: (0, 0)),
            pl.BlockSpec((N, E), lambda i: (0, 0)),
        ],
        out_specs=pl.BlockSpec((1, N, E), lambda i: (i, 0, 0)),
        compiler_params=pltpu.CompilerParams(dimension_semantics=("parallel",)),
    )(patches, w, b, pos)


def _encoder_stack_kernel(x_ref, cls_ref,
                          ln1_ref, wqkv_ref, bqkv_ref, wproj_ref, bproj_ref,
                          ln2_ref, w1_ref, b1_ref, w2_ref, b2_ref,
                          lnE_ref, we_ref, be_ref,
                          o_ref, x_s, *, num_heads, scale):
    """All encoder blocks + encoder_norm + decoder_embed, one batch element.

    grid = (B, L_enc); activation lives in the x_s VMEM scratch across L.
    """
    l = pl.program_id(1)

    @pl.when(l == 0)
    def _():                                  # cls concat fused into init
        x_s[0:1, :] = cls_ref[...]
        x_s[1:, :] = x_ref[0]

    x_s[...] = _block_step(
        x_s[...], ln1_ref[0], wqkv_ref[0], bqkv_ref[0], wproj_ref[0],
        bproj_ref[0], ln2_ref[0], w1_ref[0], b1_ref[0], w2_ref[0], b2_ref[0],
        num_heads, scale)

    @pl.when(l == pl.num_programs(1) - 1)
    def _():                                  # encoder_norm + decoder_embed epilogue
        h = _ln(x_s[...], lnE_ref[0:1, :], lnE_ref[1:2, :])
        o_ref[0] = (jnp.dot(h, we_ref[...], preferred_element_type=jnp.float32)
                    + be_ref[...])


def pallas_encoder_stack(x_masked, cls_tok, stack, enc_norm,
                         dec_embed_w, dec_embed_b, num_heads):
    B, Nk, D = x_masked.shape
    T = Nk + 1
    L = stack["wqkv"].shape[0]
    Hd = stack["fc1_w"].shape[-1]
    Dd = dec_embed_w.shape[1]
    scale = 1.0 / math.sqrt(D // num_heads)

    batch3 = lambda b, l: (b, 0, 0)
    layer3 = lambda b, l: (l, 0, 0)
    const2 = lambda b, l: (0, 0)

    kernel = functools.partial(_encoder_stack_kernel, num_heads=num_heads, scale=scale)
    return pl.pallas_call(
        kernel,
        out_shape=jax.ShapeDtypeStruct((B, T, Dd), jnp.float32),
        grid=(B, L),
        in_specs=[
            pl.BlockSpec((1, Nk, D), batch3),        # masked patch tokens
            pl.BlockSpec((1, D), const2),            # cls token (+pos)
            pl.BlockSpec((1, 2, D), layer3),         # ln1 gamma;beta
            pl.BlockSpec((1, D, 3 * D), layer3),     # Wqkv (lane dense)
            pl.BlockSpec((1, 1, 3 * D), layer3),     # bqkv
            pl.BlockSpec((1, D, D), layer3),         # Wproj
            pl.BlockSpec((1, 1, D), layer3),         # bproj
            pl.BlockSpec((1, 2, D), layer3),         # ln2 gamma;beta
            pl.BlockSpec((1, D, Hd), layer3),        # fc1 w
            pl.BlockSpec((1, 1, Hd), layer3),        # fc1 b
            pl.BlockSpec((1, Hd, D), layer3),        # fc2 w
            pl.BlockSpec((1, 1, D), layer3),         # fc2 b
            pl.BlockSpec((2, D), const2),            # encoder_norm gamma;beta
            pl.BlockSpec((D, Dd), const2),           # decoder_embed w
            pl.BlockSpec((1, Dd), const2),           # decoder_embed b
        ],
        out_specs=pl.BlockSpec((1, T, Dd), batch3),
        scratch_shapes=[pltpu.VMEM((T, D), jnp.float32)],
        compiler_params=pltpu.CompilerParams(
            dimension_semantics=("parallel", "arbitrary")),
    )(x_masked, cls_tok, stack["ln1"], stack["wqkv"], stack["bqkv"],
      stack["wproj"], stack["bproj"], stack["ln2"], stack["fc1_w"],
      stack["fc1_b"], stack["fc2_w"], stack["fc2_b"],
      enc_norm, dec_embed_w, dec_embed_b)


def _decoder_stack_kernel(x_ref, pos_ref,
                          ln1_ref, wqkv_ref, bqkv_ref, wproj_ref, bproj_ref,
                          ln2_ref, w1_ref, b1_ref, w2_ref, b2_ref,
                          lnD_ref, wp_ref, bp_ref, tgt_ref, mask_ref,
                          pred_ref, loss_ref, x_s, *, num_heads, scale):
    """pos-add + all decoder blocks + decoder_norm + decoder_pred + masked loss."""
    l = pl.program_id(1)

    @pl.when(l == 0)
    def _():                                  # decoder pos-embed add fused into init
        x_s[...] = x_ref[0] + pos_ref[...]

    x_s[...] = _block_step(
        x_s[...], ln1_ref[0], wqkv_ref[0], bqkv_ref[0], wproj_ref[0],
        bproj_ref[0], ln2_ref[0], w1_ref[0], b1_ref[0], w2_ref[0], b2_ref[0],
        num_heads, scale)

    @pl.when(l == pl.num_programs(1) - 1)
    def _():                                  # decoder_norm + decoder_pred + loss
        h = _ln(x_s[...], lnD_ref[0:1, :], lnD_ref[1:2, :])
        pred = (jnp.dot(h, wp_ref[...], preferred_element_type=jnp.float32)
                + bp_ref[...])
        pred = pred[1:, :]                    # drop cls token
        pred_ref[0] = pred
        d = pred - tgt_ref[0]
        per_patch = jnp.mean(d * d, axis=-1, keepdims=True)        # (N, 1)
        masked = per_patch * mask_ref[0]                            # (N, 1)
        loss_ref[0] = jnp.sum(masked, axis=(0, 1), keepdims=True)   # (1, 1)


def pallas_decoder_stack(x, dec_pos, stack, dec_norm, pred_w, pred_b,
                         target, mask, num_heads):
    B, T, D = x.shape
    N = T - 1
    Pd = pred_w.shape[1]
    L = stack["wqkv"].shape[0]
    Hd = stack["fc1_w"].shape[-1]
    scale = 1.0 / math.sqrt(D // num_heads)

    batch3 = lambda b, l: (b, 0, 0)
    layer3 = lambda b, l: (l, 0, 0)
    const2 = lambda b, l: (0, 0)

    kernel = functools.partial(_decoder_stack_kernel, num_heads=num_heads, scale=scale)
    pred, loss_part = pl.pallas_call(
        kernel,
        out_shape=(jax.ShapeDtypeStruct((B, N, Pd), jnp.float32),
                   jax.ShapeDtypeStruct((B, 1, 1), jnp.float32)),
        grid=(B, L),
        in_specs=[
            pl.BlockSpec((1, T, D), batch3),         # unshuffled decoder tokens
            pl.BlockSpec((T, D), const2),            # decoder pos embed
            pl.BlockSpec((1, 2, D), layer3),
            pl.BlockSpec((1, D, 3 * D), layer3),
            pl.BlockSpec((1, 1, 3 * D), layer3),
            pl.BlockSpec((1, D, D), layer3),
            pl.BlockSpec((1, 1, D), layer3),
            pl.BlockSpec((1, 2, D), layer3),
            pl.BlockSpec((1, D, Hd), layer3),
            pl.BlockSpec((1, 1, Hd), layer3),
            pl.BlockSpec((1, Hd, D), layer3),
            pl.BlockSpec((1, 1, D), layer3),
            pl.BlockSpec((2, D), const2),            # decoder_norm gamma;beta
            pl.BlockSpec((D, Pd), const2),           # decoder_pred w
            pl.BlockSpec((1, Pd), const2),           # decoder_pred b
            pl.BlockSpec((1, N, Pd), batch3),        # patchified target
            pl.BlockSpec((1, N, 1), batch3),         # mask
        ],
        out_specs=[pl.BlockSpec((1, N, Pd), batch3),
                   pl.BlockSpec((1, 1, 1), batch3)],
        scratch_shapes=[pltpu.VMEM((T, D), jnp.float32)],
        compiler_params=pltpu.CompilerParams(
            dimension_semantics=("parallel", "arbitrary")),
    )(x, dec_pos, stack["ln1"], stack["wqkv"], stack["bqkv"], stack["wproj"],
      stack["bproj"], stack["ln2"], stack["fc1_w"], stack["fc1_b"],
      stack["fc2_w"], stack["fc2_b"], dec_norm, pred_w, pred_b, target, mask)
    return pred, loss_part


# ----------------------------------------------------------------------------
# Deterministic parameter initialization (synthetic weights)
# ----------------------------------------------------------------------------
def _xavier_uniform(key, fan_in, fan_out, shape):
    bound = math.sqrt(6.0 / (fan_in + fan_out))
    return jax.random.uniform(key, shape, jnp.float32, -bound, bound)


def _init_linear(key, d_in, d_out):
    kw, kb = jax.random.split(key)
    w = _xavier_uniform(kw, d_in, d_out, (d_in, d_out))
    b = jax.random.uniform(kb, (d_out,), jnp.float32, -0.01, 0.01)
    return w, b


def _init_stack(key, num_layers, dim, mlp_ratio):
    """Per-layer weights stacked along a leading layer axis (lane-dense slabs)."""
    hidden = int(dim * mlp_ratio)
    layer_keys = jax.random.split(key, num_layers)
    acc = {k: [] for k in ("ln1", "wqkv", "bqkv", "wproj", "bproj", "ln2",
                           "fc1_w", "fc1_b", "fc2_w", "fc2_b")}
    ln_init = jnp.stack([jnp.ones((dim,), jnp.float32),
                         jnp.zeros((dim,), jnp.float32)])
    for k in layer_keys:
        ks = jax.random.split(k, 4)
        w_qkv, b_qkv = _init_linear(ks[0], dim, 3 * dim)
        w_pr, b_pr = _init_linear(ks[1], dim, dim)
        w1, b1 = _init_linear(ks[2], dim, hidden)
        w2, b2 = _init_linear(ks[3], hidden, dim)
        acc["ln1"].append(ln_init)
        acc["wqkv"].append(w_qkv)
        acc["bqkv"].append(b_qkv[None, :])
        acc["wproj"].append(w_pr)
        acc["bproj"].append(b_pr[None, :])
        acc["ln2"].append(ln_init)
        acc["fc1_w"].append(w1)
        acc["fc1_b"].append(b1[None, :])
        acc["fc2_w"].append(w2)
        acc["fc2_b"].append(b2[None, :])
    return {k: jnp.stack(v) for k, v in acc.items()}


def _get_1d_sincos_pos_embed_from_grid(embed_dim, pos):
    omega = np.arange(embed_dim // 2, dtype=np.float64)
    omega /= embed_dim / 2.0
    omega = 1.0 / 10000 ** omega
    out = np.einsum("m,d->md", pos.reshape(-1), omega)
    return np.concatenate([np.sin(out), np.cos(out)], axis=1)


def get_2d_sincos_pos_embed(embed_dim, grid_size, cls_token=False):
    grid_h = np.arange(grid_size, dtype=np.float32)
    grid_w = np.arange(grid_size, dtype=np.float32)
    grid = np.meshgrid(grid_w, grid_h)
    grid = np.stack(grid, axis=0).reshape([2, 1, grid_size, grid_size])
    emb_h = _get_1d_sincos_pos_embed_from_grid(embed_dim // 2, grid[0])
    emb_w = _get_1d_sincos_pos_embed_from_grid(embed_dim // 2, grid[1])
    pos = np.concatenate([emb_h, emb_w], axis=1)
    if cls_token:
        pos = np.concatenate([np.zeros([1, embed_dim]), pos], axis=0)
    return pos


def init_params(key, cfg):
    p = cfg["patch_size"]
    C = cfg["in_channels"]
    E = cfg["embed_dim"]
    Dd = cfg["decoder_embed_dim"]
    num_patches = (cfg["image_size"] // p) ** 2
    gs = int(num_patches ** 0.5)
    patch_dim = C * p * p

    keys = jax.random.split(key, 8)
    params = {
        # Conv2d(kernel=stride=patch) == linear on flattened (C,p,p) patches
        "patch_w": _xavier_uniform(keys[0], patch_dim, E, (patch_dim, E)),
        "patch_b": jax.random.uniform(keys[1], (1, E), jnp.float32, -0.01, 0.01),
        "cls_token": 0.02 * jax.random.normal(keys[2], (1, E), jnp.float32),
        "mask_token": 0.02 * jax.random.normal(keys[3], (1, 1, Dd), jnp.float32),
        "enc_pos": jnp.asarray(
            get_2d_sincos_pos_embed(E, gs, cls_token=True), jnp.float32),
        "dec_pos": jnp.asarray(
            get_2d_sincos_pos_embed(Dd, gs, cls_token=True), jnp.float32),
        "enc_norm": jnp.stack([jnp.ones((E,), jnp.float32),
                               jnp.zeros((E,), jnp.float32)]),
        "dec_norm": jnp.stack([jnp.ones((Dd,), jnp.float32),
                               jnp.zeros((Dd,), jnp.float32)]),
        "encoder": _init_stack(keys[4], cfg["num_encoder_layers"], E, cfg["mlp_ratio"]),
        "decoder": _init_stack(keys[5], cfg["num_decoder_layers"], Dd, cfg["mlp_ratio"]),
    }
    w, b = _init_linear(keys[6], E, Dd)
    params["dec_embed_w"], params["dec_embed_b"] = w, b.reshape(1, Dd)
    w, b = _init_linear(keys[7], Dd, patch_dim)
    params["dec_pred_w"], params["dec_pred_b"] = w, b.reshape(1, patch_dim)
    return params


# ----------------------------------------------------------------------------
# Model forward (data-dependent glue in JAX, compute in fused Pallas kernels)
# ----------------------------------------------------------------------------
def random_masking(x, mask_ratio, key):
    B, L, D = x.shape
    len_keep = int(L * (1 - mask_ratio))
    # TODO(synk): torch.rand/argsort-based shuffle + gather has no clean Pallas
    # equivalent (data-dependent permutation); done in host JAX.
    noise = jax.random.uniform(key, (B, L))
    ids_shuffle = jnp.argsort(noise, axis=1)
    ids_restore = jnp.argsort(ids_shuffle, axis=1)
    ids_keep = ids_shuffle[:, :len_keep]
    x_masked = jnp.take_along_axis(x, ids_keep[:, :, None], axis=1)
    mask = jnp.ones((B, L), jnp.float32)
    mask = mask.at[:, :len_keep].set(0.0)
    mask = jnp.take_along_axis(mask, ids_restore, axis=1)
    return x_masked, mask, ids_restore


def patchify(imgs, p):
    b, c, h, w = imgs.shape
    gh, gw = h // p, w // p
    x = imgs.reshape(b, c, gh, p, gw, p)
    x = jnp.einsum("bchpwq->bhwpqc", x)
    return x.reshape(b, gh * gw, p * p * c)


def forward_encoder(params, x, mask_ratio, key, cfg):
    B, C, H, W = x.shape
    p = cfg["patch_size"]
    gh, gw = H // p, W // p

    # PatchEmbed: extract (C,p,p)-ordered patches (layout plumbing in JAX),
    # projection + bias + pos-embed add fused in one Pallas kernel.
    patches = (
        x.reshape(B, C, gh, p, gw, p)
        .transpose(0, 2, 4, 1, 3, 5)
        .reshape(B, gh * gw, C * p * p)
    )
    emb = pallas_patch_embed(patches, params["patch_w"], params["patch_b"],
                             params["enc_pos"][1:, :])

    x_masked, mask, ids_restore = random_masking(emb, mask_ratio, key)

    cls_tok = params["cls_token"] + params["enc_pos"][:1, :]      # (1, E)

    # Fused: cls concat + all encoder blocks + encoder_norm + decoder_embed.
    # (The final encoder LayerNorm is composed with decoder_embed; identical
    # math to the reference pipeline.)
    dec_tokens = pallas_encoder_stack(
        x_masked, cls_tok, params["encoder"], params["enc_norm"],
        params["dec_embed_w"], params["dec_embed_b"], cfg["num_encoder_heads"])
    return dec_tokens, mask, ids_restore


def forward_decoder_and_loss(params, dec_tokens, ids_restore, target, mask, cfg):
    B, Tk, Dd = dec_tokens.shape
    L = ids_restore.shape[1]

    # TODO(synk): mask-token unshuffle (gather over ids_restore) kept in host
    # JAX; could move in-kernel via PrefetchScalarGridSpec + dynamic row reads.
    mask_tokens = jnp.broadcast_to(params["mask_token"], (B, L + 1 - Tk, Dd))
    x_ = jnp.concatenate([dec_tokens[:, 1:, :], mask_tokens], axis=1)
    x_ = jnp.take_along_axis(x_, ids_restore[:, :, None], axis=1)
    x = jnp.concatenate([dec_tokens[:, :1, :], x_], axis=1)        # (B, L+1, Dd)

    # Fused: pos add + all decoder blocks + decoder_norm + decoder_pred +
    # drop-cls + masked MSE loss (per-batch partial sums).
    pred, loss_part = pallas_decoder_stack(
        x, params["dec_pos"], params["decoder"], params["dec_norm"],
        params["dec_pred_w"], params["dec_pred_b"],
        target, mask[:, :, None], cfg["num_decoder_heads"])
    return pred, jnp.sum(loss_part)


def mae_forward(params, x, mask_ratio, key, cfg):
    dec_tokens, mask, ids_restore = forward_encoder(params, x, mask_ratio, key, cfg)
    # TODO(synk): reference forward_loss compares pred to raw ori_x (shape-
    # mismatched) and its patchify asserts h//p==0; implemented the standard
    # MAE loss vs the patchified target, keeping the reference's un-normalized
    # (loss*mask).sum() semantics.
    target = patchify(x, cfg["patch_size"])
    pred, loss = forward_decoder_and_loss(params, dec_tokens, ids_restore,
                                          target, mask, cfg)
    return loss, pred, mask


# ----------------------------------------------------------------------------
if __name__ == "__main__":
    cfg = dict(
        image_size=16,
        patch_size=4,
        in_channels=3,
        embed_dim=32,
        decoder_embed_dim=32,
        num_encoder_layers=2,
        num_encoder_heads=4,
        num_decoder_layers=2,
        num_decoder_heads=4,
        mlp_ratio=4.0,
    )
    root = jax.random.PRNGKey(0)
    k_params, k_img, k_mask = jax.random.split(root, 3)

    params = init_params(k_params, cfg)
    x = jax.random.normal(
        k_img, (2, cfg["in_channels"], cfg["image_size"], cfg["image_size"]),
        jnp.float32)

    loss, pred, mask = mae_forward(params, x, 0.75, k_mask, cfg)
    jax.block_until_ready((loss, pred, mask))

    assert pred.shape == (2, 16, cfg["patch_size"] ** 2 * cfg["in_channels"])
    assert mask.shape == (2, 16)
    assert loss.shape == ()
    assert bool(jnp.isfinite(loss))
    print("KERNEL_OK")
</pallas_src>

<mosaic_0001>
module attributes {stable_mosaic.version = 11 : i64} {
  func.func @_patch_embed_kernel(%arg0: i32, %arg1: memref<1x16x48xf32, #tpu.memory_space<vmem>>, %arg2: memref<48x32xf32, #tpu.memory_space<vmem>>, %arg3: memref<1x32xf32, #tpu.memory_space<vmem>>, %arg4: memref<16x32xf32, #tpu.memory_space<vmem>>, %arg5: memref<1x16x32xf32, #tpu.memory_space<vmem>>) attributes {dimension_semantics = [#tpu.dimension_semantics<parallel>], iteration_bounds = array<i64: 2>, scalar_prefetch = 0 : i64, scratch_operands = 0 : i64, tpu.core_type = #tpu.core_type<tc>, window_params = [{transform_indices = @transform_0, window_bounds = array<i64: 1, 16, 48>}, {pipeline_mode = #tpu.pipeline_mode<synchronous>, transform_indices = @transform_1, window_bounds = array<i64: 48, 32>}, {pipeline_mode = #tpu.pipeline_mode<synchronous>, transform_indices = @transform_2, window_bounds = array<i64: 1, 32>}, {pipeline_mode = #tpu.pipeline_mode<synchronous>, transform_indices = @transform_3, window_bounds = array<i64: 16, 32>}, {transform_indices = @transform_4, window_bounds = array<i64: 1, 16, 32>}]} {
    %c0 = arith.constant 0 : index
    %c0_0 = arith.constant 0 : index
    %c0_1 = arith.constant 0 : index
    %0 = vector.load %arg1[%c0, %c0_0, %c0_1] : memref<1x16x48xf32, #tpu.memory_space<vmem>>, vector<1x16x48xf32>
    %1 = vector.shape_cast %0 : vector<1x16x48xf32> to vector<16x48xf32>
    %c0_2 = arith.constant 0 : index
    %c0_3 = arith.constant 0 : index
    %2 = vector.load %arg2[%c0_2, %c0_3] : memref<48x32xf32, #tpu.memory_space<vmem>>, vector<48x32xf32>
    %cst = arith.constant dense<0.000000e+00> : vector<16x32xf32>
    %3 = tpu.matmul %1, %2, %cst {dimension_numbers = #tpu.dot_dimension_numbers<[1], [0], [0], [1], [0, 0, 1, 1], [], []>} : vector<16x48xf32>, vector<48x32xf32>, vector<16x32xf32> -> vector<16x32xf32>
    %c0_4 = arith.constant 0 : index
    %c0_5 = arith.constant 0 : index
    %4 = vector.load %arg3[%c0_4, %c0_5] : memref<1x32xf32, #tpu.memory_space<vmem>>, vector<1x32xf32>
    %5 = vector.broadcast %4 : vector<1x32xf32> to vector<16x32xf32>
    %6 = arith.addf %3, %5 : vector<16x32xf32>
    %c0_6 = arith.constant 0 : index
    %c0_7 = arith.constant 0 : index
    %7 = vector.load %arg4[%c0_6, %c0_7] : memref<16x32xf32, #tpu.memory_space<vmem>>, vector<16x32xf32>
    %8 = arith.addf %6, %7 : vector<16x32xf32>
    %c0_8 = arith.constant 0 : index
    %c0_9 = arith.constant 0 : index
    %c0_10 = arith.constant 0 : index
    %9 = vector.load %arg5[%c0_8, %c0_9, %c0_10] : memref<1x16x32xf32, #tpu.memory_space<vmem>>, vector<1x16x32xf32>
    %10 = vector.shape_cast %9 : vector<1x16x32xf32> to vector<16x32xf32>
    %11 = vector.shape_cast %8 : vector<16x32xf32> to vector<1x16x32xf32>
    tpu.vector_store %arg5[%c0_8, %c0_9, %c0_10], %11 {strides = array<i32>} : memref<1x16x32xf32, #tpu.memory_space<vmem>>, vector<1x16x32xf32>,
    return
  }
  func.func @transform_0(%arg0: i32) -> (i32, i32, i32) {
    %c0_i32 = arith.constant 0 : i32
    %c0_i32_0 = arith.constant 0 : i32
    %c0_i32_1 = arith.constant 0 : i32
    return %arg0, %c0_i32, %c0_i32_0 : i32, i32, i32
  }
  func.func @transform_1(%arg0: i32) -> (i32, i32) {
    %c0_i32 = arith.constant 0 : i32
    %c0_i32_0 = arith.constant 0 : i32
    %c0_i32_1 = arith.constant 0 : i32
    return %c0_i32, %c0_i32_0 : i32, i32
  }
  func.func @transform_2(%arg0: i32) -> (i32, i32) {
    %c0_i32 = arith.constant 0 : i32
    %c0_i32_0 = arith.constant 0 : i32
    %c0_i32_1 = arith.constant 0 : i32
    return %c0_i32, %c0_i32_0 : i32, i32
  }
  func.func @transform_3(%arg0: i32) -> (i32, i32) {
    %c0_i32 = arith.constant 0 : i32
    %c0_i32_0 = arith.constant 0 : i32
    %c0_i32_1 = arith.constant 0 : i32
    return %c0_i32, %c0_i32_0 : i32, i32
  }
  func.func @transform_4(%arg0: i32) -> (i32, i32, i32) {
    %c0_i32 = arith.constant 0 : i32
    %c0_i32_0 = arith.constant 0 : i32
    %c0_i32_1 = arith.constant 0 : i32
    return %arg0, %c0_i32, %c0_i32_0 : i32, i32, i32
  }
}

</mosaic_0001>

<bundles_post_ra>
// kernel: tpu_custom_call.1
= control target key start
LH: loop header
LB: loop body
LE: loop exit
PB: predicated region body
PF: predicated region fallthrough
CT: control target
= control target key end

     0   :  { %9 = vsyncpa [#allocation3], 0  ;;  %s691_s0 = inlined_call_operand.vmem [shape: f32[2,16,48], index: 0, kind: input, shape index: {}]   ;;  %s692_s1 = inlined_call_operand.vmem [shape: f32[48,32], index: 1, kind: input, shape index: {}]   ;;  %s693_s2 = inlined_call_operand.vmem [shape: f32[1,32], index: 2, kind: input, shape index: {}]   ;;  %s694_s3 = inlined_call_operand.vmem [shape: f32[16,32], index: 3, kind: input, shape index: {}]   ;;  %s695_s4 = inlined_call_operand.hbm [shape: f32[2,16,32], index: 4, kind: output, shape index: {}]  }
   0x1   :  { %11 = vsyncpa [#allocation3 + $0x1], 0  ;;  %s561_s15 = smov 0   ;;  %s563_s16 = smov 0  }
   0x2   :  { %s565_s17 = smov 0   ;;  %s567_s18 = smov 0  }
   0x3 LB: > { %s582_s19 = sadd.s32 4294967295, %s531_s18   ;;  %s376_s20 = sadd.s32 4294967294, %s531_s18   ;;  %s531_s18 = sphi %s567_s18, %s701_s18   ;;  %s527_s17 = sphi %s565_s17, %s700_s17   ;;  %s523_s16 = sphi %s563_s16, %s699_s16   ;;  %s519_s15 = sphi %s561_s15, %s698_s15  }
   0x4   : > { %s586_s21 = sadd.s32 1, %s531_s18   ;;  %s113_s22 = sadd.s32 1, %s527_s17 }
   0x5   : > { %s110_s23 = ssub.s32 %s531_s18, %s586_s21  ;;  %p123_p0 = scmp.ne.s32.totalorder %s527_s17, %s523_s16 }
   0x6   : > { %p111_p1 = scmp.eq.s32.totalorder %s110_s23, 0  ;;  %p124_p2 = scmp.eq.s32.totalorder %s582_s19, 1 }
   0x7   : > { %p129_p3 = scmp.ne.s32.totalorder %s523_s16, %s519_s15  ;;  %p130_p4 = scmp.eq.s32.totalorder %s376_s20, 1 }
   0x8   : > { %s597_s24 = scalar_select %p111_p1, %s527_s17, %s113_s22  }
   0x9   : > { %p599_p5 = por %p124_p2, %p123_p0  ;;  %p603_p6 = por %p130_p4, %p129_p3 }
   0xa   : > { %p379_p7 = scmp.ge.s32.totalorder %s531_s18, 1  ;;  %p165_p8 = scmp.lt.s32.totalorder %s531_s18, 3 }
   0xc   : > { %p166_p9 = pnand %p379_p7, %p165_p8 }
   0xd   : > { %v198_v0 = vld [vmem:[%s692_s1] sm:$0xff] (!%p166_p9)  ;;  %v199_v1 = vld [vmem:[%s692_s1 + $0x8] sm:$0xff] (!%p166_p9)  ;;  %v200_v2 = vld [vmem:[%s692_s1 + $0x10] sm:$0xff] (!%p166_p9)  ;;  %p191_p10 = scmp.lt.s32.totalorder (!%p166_p9), %s582_s19, 1  ;;  %vm211_vm0 = vcmask (!%p166_p9), 392192   ;;  %s188_s27 = sand.u32 (!%p166_p9), 1, %s523_s16  }
   0xe   : > { %169 = sbr.rel (%p166_p9) target bundleno = 260 (0x104), region = 36  ;;  %v416_v3 = vpack.c.bf16 (!%p166_p9), %v199_v1, %v198_v0  ;;  %v201_v4 = vld [vmem:[%s692_s1 + $0x18] sm:$0xff] (!%p166_p9)  ;;  %v202_v6 = vld [vmem:[%s692_s1 + $0x20] sm:$0xff] (!%p166_p9)  ;;  %v203_v7 = vld [vmem:[%s692_s1 + $0x28] sm:$0xff] (!%p166_p9)  ;;  %s380_s28 = sshll.u32 (!%p166_p9), %s188_s27, 4  ;;  %vm297_vm1 = vcmask (!%p166_p9), 261120  }
   0xf   : > { %v420_v5 = vpack.c.bf16 (!%p166_p9), %v201_v4, %v200_v2  ;;  %v424_v8 = vpack.c.bf16 (!%p166_p9), %v203_v7, %v202_v6  ;;  %v383_v11 = vld [vmem:[%s693_s2] ss:$0 sm:$0xff] (!%p166_p9)  ;;  %v294_v13 = vld [vmem:[%s694_s3 + $0x8] sm:$0xff] (!%p166_p9)  ;;  %s190_s7 = scalar_lea.vmem (!%p166_p9), [#allocation2], %s380_s28  ;;  %s392_s9 = sshll.u32 (!%p166_p9), %s582_s19, 8 }
  0x10   : > { %417 = vmatprep.subr.bf16.mxu0 (!%p166_p9), %v416_v3  ;;  %s314_s8 = sshll.u32 (!%p166_p9), %s190_s7, 4  ;;  %v293_v16 = vld [vmem:[%s694_s3] sm:$0xff] (!%p166_p9)  ;;  %s533_s22 = smov (!%p166_p9), [#allocation2]   ;;  %s648_s8 = int_to_ptr.vmem [resolvable:$true] %s314_s8 }
  0x11   : > { %419 = vmatpush3.bf16.msra.mxu0 (!%p166_p9), %v416_v3  ;;  %s469_s20 = scalar_lea.vmem (!%p166_p9), %s648_s8, 256 }
  0x12   : > { %421 = vmatprep.subr.bf16.mxu0 (!%p166_p9), %v420_v5  ;;  %p470_p11 = scmp.ne.s32.totalorder (!%p166_p9), %s648_s8, %s469_s20 }
  0x14   : > { %p471_p12 = pnand (!%p166_p9), %p470_p11, %p599_p5 }
  0x15   : > { %s192_s13 = scalar_select %p191_p10, %s582_s19, 1  ;;  %423 = vmatpush3.bf16.msra.mxu0 %v420_v5 }
  0x16   : > { %425 = vmatprep.subr.bf16.mxu0 %v424_v8  ;;  %s650_s19 = scalar_lea.sflag [#allocation3], %s188_s27  ;;  %p472_p13 = pneg %p471_p12 }
  0x17   : > { %s391_s14 = sshll.u32 %s192_s13, 4 }
  0x18   : > { %s195_s23 = scalar_lea.vmem %s691_s0, %s391_s14  ;;  %s646_s14 = scalar_lea.hbm %s695_s4, %s392_s9 }
  0x19   : > { %v196_v9 = vld [vmem:[%s195_s23] sm:$0xff]  ;;  %427 = vmatpush3.bf16.msra.mxu0 %v424_v8  ;;  %v197_v10 = vld [vmem:[%s195_s23 + $0x8] sm:$0xff]  ;;  %s473_s23 = sshll.u32 %s533_s22, 4  ;;  %s474_s23 = int_to_ptr.vmem [resolvable:$false] %s473_s23 }
  0x1a   : > { %413 = vmatprep.mubr.msk.f32.mxu0 %vm211_vm0, %v196_v9  ;;  %s475_s28 = scalar_lea.vmem %s474_s23, 512  ;;  %p476_p0 = scmp.lt.s32.totalorder %s648_s8, %s474_s23 }
  0x1b   : > { %p477_p1 = scmp.lt.s32.totalorder %s475_s28, %s469_s20 }
  0x1c   : > { %414 = vmatmul.mubr.msk.f32.vlgmr.msra.gmra.mrb[0].mxu0 %vm211_vm0, %v197_v10 }
  0x1d   : > { %p478_p2 = por %p477_p1, %p476_p0 }
  0x1f   : > { %p479_p3 = pnand %p478_p2, %p472_p13 }
  0xef   : > { %v415_v12 = vpop.f32.mrb[0].mxu0 }
  0xf0   : > { %v290_v14 = vadd.f32 %v415_v12, %v383_v11  ;;  %v284_v15 = vpop.f32.mrb[1].mxu0 }
  0xf1   : > { %v285_v17 = vadd.f32 %v383_v11, %v284_v15 }
  0xf2   : > { %v296_v18 = vadd.f32 %v294_v13, %v290_v14 }
  0xf3   : > { %v295_v19 = vadd.f32 %v293_v16, %v285_v17 }
  0xf4   : > { %299 = vst.msk [vmem:[%s190_s7 + $0x8] sm:$0xff] %vm297_vm1, %v296_v18 }
  0xf5   : > { %298 = vst.msk [vmem:[%s190_s7] sm:$0xff] %vm297_vm1, %v295_v19 }
  0xf6   : > { %482 = shalt.err (!%p479_p3)
}
  0xf7   : > { %s483_s27 = scalar_lea.hbm %s646_s14, 256  ;;  %s487_s5 = scalar_lea.hbm %s695_s4, 512 }
  0xf8   : > { %p484_p4 = scmp.ne.s32.totalorder %s646_s14, %s483_s27  ;;  %p488_p9 = scmp.lt.u32.totalorder %s646_s14, %s695_s4 }
  0xf9   : > { %p489_p10 = scmp.lt.u32.totalorder %s487_s5, %s483_s27  ;;  %p491_p12 = scmp.lt.u32.totalorder %s483_s27, %s646_s14 }
  0xfa   : > { %p485_p7 = pnand %p484_p4, %p599_p5 }
  0xfb   : > { %p490_p11 = por %p489_p10, %p488_p9 }
  0xfc   : > { %p486_p8 = pneg %p485_p7 }
  0xfd   : > { %p492_p13 = por %p491_p12, %p490_p11 }
  0xff   : > { %p493_p0 = pnand %p492_p13, %p486_p8 }
 0x101   : > { %496 = shalt.err (!%p493_p0)
}
 0x102   : > { %s534_s9 = smov 128   ;;  %s535_s10 = smov 8  }
 0x103   : > { %428 = dma.vmem_to_hbm [thread:$0]  (%p599_p5), %s648_s8, 256, %s646_s14, %s650_s19, %s534_s9, %s534_s9, %s535_s10  }
 0x104 PF: > { %p434_p1 = scmp.ge.s32.totalorder %s531_s18, 2  ;;  %s329_s11 = sand.u32 1, %s519_s15  }
 0x105   : > { %s330_s12 = scalar_lea.sflag [#allocation3], %s329_s11 }
 0x106   : > { %p431_p2 = pnand %p434_p1, %p603_p6 }
 0x108   : > { %514 = dma.done.wait (!%p431_p2), %s330_s12, 256  }
 0x109   : > { %516 = vsyncadd (!%p431_p2), %s330_s12, 4294967040  ;;  %p14_p3 = scmp.ge.s32.totalorder %s586_s21, 4   ;;  %s698_s15 = smov %s523_s16 }
 0x10a   : > { %s699_s16 = smov %s527_s17  ;;  %s700_s17 = smov %s597_s24 }
 0x10b   : > { %s701_s18 = smov %s586_s21  ;;  %16 = sbr.rel (!%p14_p3) target bundleno = 3 (0x3), region = 71 }
 0x112   :  { %335 = vsyncpa [#allocation3], 1 }
 0x113   :  { %337 = vsyncpa [#allocation3 + $0x1], 1 }

</bundles_post_ra>
